<compile_context>
chip_gen: v5e
topology: v5e:2x2
jax: 0.10.0
libtpu: 0.0.40
codegen_flags: <defaults>
</compile_context>

<pallas_src>
import functools

import jax
import jax.numpy as jnp
from jax import lax
from jax.experimental import pallas as pl
from jax.experimental.pallas import tpu as pltpu

H1_RAW = 400      # PyTorch hidden width
H1_PAD = 512      # padded hidden width (lane-aligned; zero padding is exact)
H2 = 128          # second hidden width
LATENT = 64       # instance head width
NEG_BIG = -1e30   # bias for non-classifier lanes in the softmax path
TB_MAX = 1024     # max batch tile (comfortably within VMEM on v5e/v6e/v7x)


def _round_up(x, m):
    return (x + m - 1) // m * m


# ---------------------------------------------------------------------------
# Kernel
# ---------------------------------------------------------------------------
def mynet_kernel(x_ref,
                 w1_ref, b1_ref,
                 w2_ref, b2_ref,
                 wh_ref, blat_ref, bcls_ref,
                 out_ref):
    # Linear(n_input, 400 [padded to 512]) + ReLU.  (Dropout is identity in eval.)
    x = x_ref[...]                                                     # bf16 (TB, n_in)
    h1 = jnp.dot(x, w1_ref[...], preferred_element_type=jnp.float32) + b1_ref[...]
    h1 = jnp.maximum(h1, 0.0)                                          # f32

    # Linear(512, 128) + LeakyReLU(negative_slope=0.01).
    h2 = jnp.dot(h1.astype(w2_ref.dtype), w2_ref[...],
                 preferred_element_type=jnp.float32) + b2_ref[...]
    h2 = jnp.where(h2 >= 0.0, h2, 0.01 * h2)                           # f32

    # Fused heads: lanes [0, 64) = instance head, lanes [64, 64+n_output) = classifier,
    # remaining lanes are zero weight columns.
    heads = jnp.dot(h2.astype(wh_ref.dtype), wh_ref[...],
                    preferred_element_type=jnp.float32)                # f32 (TB, HEAD_N)

    # Instance head: add its bias row (zeros outside lanes [0, 64)).
    latent = heads + blat_ref[...]

    # Classifier head: bias row is bc on classifier lanes and -1e30 everywhere else, so
    # softmax over all HEAD_N lanes is exact (padded lanes contribute exp -> 0).
    logits = heads + bcls_ref[...]
    m = jnp.max(logits, axis=1, keepdims=True)
    e = jnp.exp(logits - m)
    denom = jnp.sum(e, axis=1, keepdims=True)
    probs = e * pl.reciprocal(denom, approx=False)

    # Pack both results into one lane-dense store: lanes [0,64) latent, rest probs
    # (probs is exactly 0 on latent lanes, so the select only protects the latent half).
    lane = lax.broadcasted_iota(jnp.int32, heads.shape, 1)
    out_ref[...] = jnp.where(lane < LATENT, latent, probs).astype(out_ref.dtype)


# ---------------------------------------------------------------------------
# Wrapper
# ---------------------------------------------------------------------------
@functools.partial(jax.jit,
                   static_argnames=("n_input", "n_output", "head_n", "tb_max"))
def _mynet_forward_impl(x, w1, b1, w2, b2, wh, b_lat, b_cls,
                        *, n_input, n_output, head_n, tb_max=TB_MAX):
    # PyTorch: x.view(-1, n_input)   (glue in plain JAX)
    x = x.reshape(-1, n_input).astype(jnp.float32)
    B = x.shape[0]

    # Balanced batch tiling: tiles of equal size (multiple of 8), minimal padding.
    B8 = _round_up(max(B, 1), 8)
    num_tiles = pl.cdiv(B8, tb_max)
    TB = _round_up(pl.cdiv(B8, num_tiles), 8)
    B_pad = TB * num_tiles
    if B_pad != B:
        x = jnp.pad(x, ((0, B_pad - B), (0, 0)))
    x = x.astype(jnp.bfloat16)          # MXU input dtype; halves x DMA traffic

    grid = (num_tiles,)

    flops = 2 * B_pad * (n_input * H1_PAD + H1_PAD * H2 + H2 * head_n)
    bytes_accessed = (x.size * 2                       # x (bf16)
                      + B_pad * head_n * 4             # fused f32 output
                      + (w1.size + w2.size + wh.size) * 2
                      + (b1.size + b2.size + b_lat.size + b_cls.size) * 4)

    fused = pl.pallas_call(
        mynet_kernel,
        out_shape=jax.ShapeDtypeStruct((B_pad, head_n), jnp.float32),
        grid=grid,
        in_specs=[
            pl.BlockSpec((TB, n_input), lambda i: (i, 0)),        # x: tiled over batch
            pl.BlockSpec((n_input, H1_PAD), lambda i: (0, 0)),    # w1: VMEM-resident
            pl.BlockSpec((1, H1_PAD), lambda i: (0, 0)),          # b1
            pl.BlockSpec((H1_PAD, H2), lambda i: (0, 0)),         # w2
            pl.BlockSpec((1, H2), lambda i: (0, 0)),              # b2
            pl.BlockSpec((H2, head_n), lambda i: (0, 0)),         # fused head weights
            pl.BlockSpec((1, head_n), lambda i: (0, 0)),          # instance bias row
            pl.BlockSpec((1, head_n), lambda i: (0, 0)),          # classifier bias row
        ],
        out_specs=pl.BlockSpec((TB, head_n), lambda i: (i, 0)),
        compiler_params=pltpu.CompilerParams(
            dimension_semantics=("parallel",)),
        cost_estimate=pl.CostEstimate(
            flops=flops,
            transcendentals=B_pad * head_n,
            bytes_accessed=bytes_accessed),
    )(x, w1, b1, w2, b2, wh, b_lat, b_cls)

    out = fused[:B, LATENT:LATENT + n_output]
    latent = fused[:B, :LATENT]
    return out, latent


def mynet_forward(x, prepped, n_input, n_output):
    return _mynet_forward_impl(
        x,
        prepped["w1"], prepped["b1"],
        prepped["w2"], prepped["b2"],
        prepped["wh"], prepped["b_lat"], prepped["b_cls"],
        n_input=n_input, n_output=n_output, head_n=prepped["head_n"])


# ---------------------------------------------------------------------------
# Parameter prep (pad 400->512, fuse heads, cast weights to bf16)
# ---------------------------------------------------------------------------
def prepare_params(params, n_input, n_output):
    head_n = _round_up(LATENT + n_output, 128)   # lane-dense head width (>=128)

    w1 = jnp.zeros((n_input, H1_PAD), jnp.float32).at[:, :H1_RAW].set(params["w1"])
    b1 = jnp.zeros((1, H1_PAD), jnp.float32).at[:, :H1_RAW].set(params["b1"])
    w2 = jnp.zeros((H1_PAD, H2), jnp.float32).at[:H1_RAW, :].set(params["w2"])
    b2 = params["b2"].astype(jnp.float32)

    wh = jnp.zeros((H2, head_n), jnp.float32)
    wh = wh.at[:, :LATENT].set(params["wi"])
    wh = wh.at[:, LATENT:LATENT + n_output].set(params["wc"])
    b_lat = jnp.zeros((1, head_n), jnp.float32).at[:, :LATENT].set(params["bi"])
    b_cls = jnp.full((1, head_n), NEG_BIG, jnp.float32)
    b_cls = b_cls.at[:, LATENT:LATENT + n_output].set(params["bc"])

    return {
        "w1": w1.astype(jnp.bfloat16), "b1": b1,
        "w2": w2.astype(jnp.bfloat16), "b2": b2,
        "wh": wh.astype(jnp.bfloat16), "b_lat": b_lat, "b_cls": b_cls,
        "head_n": head_n,
    }


def init_params(key, n_input, n_output):
    # Deterministic synthetic init (Kaiming-uniform-like scale), PyTorch layout
    # transposed to (in_features, out_features) so y = x @ W + b.
    ks = jax.random.split(key, 8)

    def lin(kw, kb, fan_in, fan_out):
        bound = 1.0 / jnp.sqrt(fan_in)
        w = jax.random.uniform(kw, (fan_in, fan_out), jnp.float32, -bound, bound)
        b = jax.random.uniform(kb, (1, fan_out), jnp.float32, -bound, bound)
        return w, b

    w1, b1 = lin(ks[0], ks[1], n_input, H1_RAW)
    w2, b2 = lin(ks[2], ks[3], H1_RAW, H2)
    wi, bi = lin(ks[4], ks[5], H2, LATENT)
    wc, bc = lin(ks[6], ks[7], H2, n_output)
    return {"w1": w1, "b1": b1, "w2": w2, "b2": b2,
            "wi": wi, "bi": bi, "wc": wc, "bc": bc}


# Pure-JAX reference using the SAME prepared (padded / bf16) params, mirroring the
# kernel's cast pattern — used only to validate the Pallas math.
def reference_forward(x, prepped, n_input, n_output):
    x = x.reshape(-1, n_input).astype(jnp.bfloat16)
    h1 = jnp.dot(x, prepped["w1"], preferred_element_type=jnp.float32) + prepped["b1"]
    h1 = jnp.maximum(h1, 0.0)
    h2 = jnp.dot(h1.astype(jnp.bfloat16), prepped["w2"],
                 preferred_element_type=jnp.float32) + prepped["b2"]
    h2 = jnp.where(h2 >= 0.0, h2, 0.01 * h2)
    heads = jnp.dot(h2.astype(jnp.bfloat16), prepped["wh"],
                    preferred_element_type=jnp.float32)
    latent = (heads + prepped["b_lat"])[:, :LATENT]
    probs = jax.nn.softmax(heads + prepped["b_cls"], axis=1)[:, LATENT:LATENT + n_output]
    return probs, latent


if __name__ == "__main__":
    n_input, n_output = 32, 10

    key = jax.random.PRNGKey(0)
    kx, kp, kx2 = jax.random.split(key, 3)
    params = init_params(kp, n_input, n_output)
    prepped = prepare_params(params, n_input, n_output)

    # Small batch (single-tile fast path).
    B = 8
    x = jax.random.normal(kx, (B, n_input), jnp.float32)
    out, latent = mynet_forward(x, prepped, n_input, n_output)
    jax.block_until_ready((out, latent))

    assert out.shape == (B, n_output)
    assert latent.shape == (B, LATENT)
    assert bool(jnp.allclose(jnp.sum(out, axis=1), 1.0, atol=1e-4))
    out_ref, lat_ref = reference_forward(x, prepped, n_input, n_output)
    assert bool(jnp.allclose(out, out_ref, atol=2e-2, rtol=2e-2))
    assert bool(jnp.allclose(latent, lat_ref, atol=2e-2, rtol=2e-2))

    # Larger, non-multiple-of-8 batch exercises batch padding + multi-step grid.
    B2 = 1037
    x2 = jax.random.normal(kx2, (B2, n_input), jnp.float32)
    out2, latent2 = mynet_forward(x2, prepped, n_input, n_output)
    jax.block_until_ready((out2, latent2))

    assert out2.shape == (B2, n_output)
    assert latent2.shape == (B2, LATENT)
    assert bool(jnp.allclose(jnp.sum(out2, axis=1), 1.0, atol=1e-4))
    out2_ref, lat2_ref = reference_forward(x2, prepped, n_input, n_output)
    assert bool(jnp.allclose(out2, out2_ref, atol=2e-2, rtol=2e-2))
    assert bool(jnp.allclose(latent2, lat2_ref, atol=2e-2, rtol=2e-2))

    print("KERNEL_OK")
</pallas_src>

<mosaic_0001>
module attributes {stable_mosaic.version = 11 : i64} {
  func.func @mynet_kernel(%arg0: i32, %arg1: memref<8x32xbf16, #tpu.memory_space<vmem>>, %arg2: memref<32x512xbf16, #tpu.memory_space<vmem>>, %arg3: memref<1x512xf32, #tpu.memory_space<vmem>>, %arg4: memref<512x128xbf16, #tpu.memory_space<vmem>>, %arg5: memref<1x128xf32, #tpu.memory_space<vmem>>, %arg6: memref<128x128xbf16, #tpu.memory_space<vmem>>, %arg7: memref<1x128xf32, #tpu.memory_space<vmem>>, %arg8: memref<1x128xf32, #tpu.memory_space<vmem>>, %arg9: memref<8x128xf32, #tpu.memory_space<vmem>>) attributes {dimension_semantics = [#tpu.dimension_semantics<parallel>], iteration_bounds = array<i64: 1>, scalar_prefetch = 0 : i64, scratch_operands = 0 : i64, tpu.core_type = #tpu.core_type<tc>, window_params = [{transform_indices = @transform_0, window_bounds = array<i64: 8, 32>}, {pipeline_mode = #tpu.pipeline_mode<synchronous>, transform_indices = @transform_1, window_bounds = array<i64: 32, 512>}, {pipeline_mode = #tpu.pipeline_mode<synchronous>, transform_indices = @transform_2, window_bounds = array<i64: 1, 512>}, {pipeline_mode = #tpu.pipeline_mode<synchronous>, transform_indices = @transform_3, window_bounds = array<i64: 512, 128>}, {pipeline_mode = #tpu.pipeline_mode<synchronous>, transform_indices = @transform_4, window_bounds = array<i64: 1, 128>}, {pipeline_mode = #tpu.pipeline_mode<synchronous>, transform_indices = @transform_5, window_bounds = array<i64: 128, 128>}, {pipeline_mode = #tpu.pipeline_mode<synchronous>, transform_indices = @transform_6, window_bounds = array<i64: 1, 128>}, {pipeline_mode = #tpu.pipeline_mode<synchronous>, transform_indices = @transform_7, window_bounds = array<i64: 1, 128>}, {transform_indices = @transform_8, window_bounds = array<i64: 8, 128>}]} {
    %c0 = arith.constant 0 : index
    %c0_0 = arith.constant 0 : index
    %0 = vector.load %arg1[%c0, %c0_0] : memref<8x32xbf16, #tpu.memory_space<vmem>>, vector<8x32xbf16>
    %c0_1 = arith.constant 0 : index
    %c0_2 = arith.constant 0 : index
    %1 = vector.load %arg2[%c0_1, %c0_2] : memref<32x512xbf16, #tpu.memory_space<vmem>>, vector<32x512xbf16>
    %cst = arith.constant dense<0.000000e+00> : vector<8x512xf32>
    %2 = tpu.matmul %0, %1, %cst {dimension_numbers = #tpu.dot_dimension_numbers<[1], [0], [0], [1], [0, 0, 1, 1], [], []>} : vector<8x32xbf16>, vector<32x512xbf16>, vector<8x512xf32> -> vector<8x512xf32>
    %c0_3 = arith.constant 0 : index
    %c0_4 = arith.constant 0 : index
    %3 = vector.load %arg3[%c0_3, %c0_4] : memref<1x512xf32, #tpu.memory_space<vmem>>, vector<1x512xf32>
    %4 = vector.broadcast %3 : vector<1x512xf32> to vector<8x512xf32>
    %5 = arith.addf %2, %4 : vector<8x512xf32>
    %cst_5 = arith.constant 0.000000e+00 : f32
    %6 = vector.broadcast %cst_5 : f32 to vector<8x512xf32>
    %7 = arith.maximumf %5, %6 : vector<8x512xf32>
    %8 = arith.truncf %7 : vector<8x512xf32> to vector<8x512xbf16>
    %c0_6 = arith.constant 0 : index
    %c0_7 = arith.constant 0 : index
    %9 = vector.load %arg4[%c0_6, %c0_7] : memref<512x128xbf16, #tpu.memory_space<vmem>>, vector<512x128xbf16>
    %cst_8 = arith.constant dense<0.000000e+00> : vector<8x128xf32>
    %10 = tpu.matmul %8, %9, %cst_8 {dimension_numbers = #tpu.dot_dimension_numbers<[1], [0], [0], [1], [0, 0, 1, 1], [], []>} : vector<8x512xbf16>, vector<512x128xbf16>, vector<8x128xf32> -> vector<8x128xf32>
    %c0_9 = arith.constant 0 : index
    %c0_10 = arith.constant 0 : index
    %11 = vector.load %arg5[%c0_9, %c0_10] : memref<1x128xf32, #tpu.memory_space<vmem>>, vector<1x128xf32>
    %12 = vector.broadcast %11 : vector<1x128xf32> to vector<8x128xf32>
    %13 = arith.addf %10, %12 : vector<8x128xf32>
    %cst_11 = arith.constant 0.000000e+00 : f32
    %14 = vector.broadcast %cst_11 : f32 to vector<8x128xf32>
    %15 = arith.cmpf oge, %13, %14 : vector<8x128xf32>
    %cst_12 = arith.constant 0.00999999977 : f32
    %16 = vector.broadcast %cst_12 : f32 to vector<8x128xf32>
    %17 = arith.mulf %16, %13 : vector<8x128xf32>
    %18 = arith.select %15, %13, %17 : vector<8x128xi1>, vector<8x128xf32>
    %19 = arith.truncf %18 : vector<8x128xf32> to vector<8x128xbf16>
    %c0_13 = arith.constant 0 : index
    %c0_14 = arith.constant 0 : index
    %20 = vector.load %arg6[%c0_13, %c0_14] : memref<128x128xbf16, #tpu.memory_space<vmem>>, vector<128x128xbf16>
    %cst_15 = arith.constant dense<0.000000e+00> : vector<8x128xf32>
    %21 = tpu.matmul %19, %20, %cst_15 {dimension_numbers = #tpu.dot_dimension_numbers<[1], [0], [0], [1], [0, 0, 1, 1], [], []>} : vector<8x128xbf16>, vector<128x128xbf16>, vector<8x128xf32> -> vector<8x128xf32>
    %c0_16 = arith.constant 0 : index
    %c0_17 = arith.constant 0 : index
    %22 = vector.load %arg7[%c0_16, %c0_17] : memref<1x128xf32, #tpu.memory_space<vmem>>, vector<1x128xf32>
    %23 = vector.broadcast %22 : vector<1x128xf32> to vector<8x128xf32>
    %24 = arith.addf %21, %23 : vector<8x128xf32>
    %c0_18 = arith.constant 0 : index
    %c0_19 = arith.constant 0 : index
    %25 = vector.load %arg8[%c0_18, %c0_19] : memref<1x128xf32, #tpu.memory_space<vmem>>, vector<1x128xf32>
    %26 = vector.broadcast %25 : vector<1x128xf32> to vector<8x128xf32>
    %27 = arith.addf %21, %26 : vector<8x128xf32>
    %cst_20 = arith.constant dense<0xFF800000> : vector<8xf32>
    %28 = vector.multi_reduction <maximumf>, %27, %cst_20 [1] : vector<8x128xf32> to vector<8xf32>
    %29 = vector.shape_cast %28 : vector<8xf32> to vector<8x1xf32>
    %30 = vector.broadcast %29 : vector<8x1xf32> to vector<8x128xf32>
    %31 = arith.subf %27, %30 : vector<8x128xf32>
    %32 = math.exp %31 : vector<8x128xf32>
    %cst_21 = arith.constant dense<0.000000e+00> : vector<8xf32>
    %33 = vector.multi_reduction <add>, %32, %cst_21 [1] : vector<8x128xf32> to vector<8xf32>
    %34 = vector.shape_cast %33 : vector<8xf32> to vector<8x1xf32>
    %35 = tpu.reciprocal %34 : vector<8x1xf32> -> vector<8x1xf32>
    %36 = vector.broadcast %35 : vector<8x1xf32> to vector<8x128xf32>
    %37 = arith.mulf %32, %36 : vector<8x128xf32>
    %38 = tpu.iota {dimensions = array<i32: 1>} : vector<8x128xi32>
    %c64_i32 = arith.constant 64 : i32
    %39 = vector.broadcast %c64_i32 : i32 to vector<8x128xi32>
    %40 = arith.cmpi slt, %38, %39 : vector<8x128xi32>
    %41 = arith.select %40, %24, %37 : vector<8x128xi1>, vector<8x128xf32>
    %c0_22 = arith.constant 0 : index
    %c0_23 = arith.constant 0 : index
    %42 = vector.load %arg9[%c0_22, %c0_23] : memref<8x128xf32, #tpu.memory_space<vmem>>, vector<8x128xf32>
    tpu.vector_store %arg9[%c0_22, %c0_23], %41 {strides = array<i32>} : memref<8x128xf32, #tpu.memory_space<vmem>>, vector<8x128xf32>,
    return
  }
  func.func @transform_0(%arg0: i32) -> (i32, i32) {
    %c0_i32 = arith.constant 0 : i32
    %c0_i32_0 = arith.constant 0 : i32
    return %arg0, %c0_i32 : i32, i32
  }
  func.func @transform_1(%arg0: i32) -> (i32, i32) {
    %c0_i32 = arith.constant 0 : i32
    %c0_i32_0 = arith.constant 0 : i32
    %c0_i32_1 = arith.constant 0 : i32
    return %c0_i32, %c0_i32_0 : i32, i32
  }
  func.func @transform_2(%arg0: i32) -> (i32, i32) {
    %c0_i32 = arith.constant 0 : i32
    %c0_i32_0 = arith.constant 0 : i32
    %c0_i32_1 = arith.constant 0 : i32
    return %c0_i32, %c0_i32_0 : i32, i32
  }
  func.func @transform_3(%arg0: i32) -> (i32, i32) {
    %c0_i32 = arith.constant 0 : i32
    %c0_i32_0 = arith.constant 0 : i32
    %c0_i32_1 = arith.constant 0 : i32
    return %c0_i32, %c0_i32_0 : i32, i32
  }
  func.func @transform_4(%arg0: i32) -> (i32, i32) {
    %c0_i32 = arith.constant 0 : i32
    %c0_i32_0 = arith.constant 0 : i32
    %c0_i32_1 = arith.constant 0 : i32
    return %c0_i32, %c0_i32_0 : i32, i32
  }
  func.func @transform_5(%arg0: i32) -> (i32, i32) {
    %c0_i32 = arith.constant 0 : i32
    %c0_i32_0 = arith.constant 0 : i32
    %c0_i32_1 = arith.constant 0 : i32
    return %c0_i32, %c0_i32_0 : i32, i32
  }
  func.func @transform_6(%arg0: i32) -> (i32, i32) {
    %c0_i32 = arith.constant 0 : i32
    %c0_i32_0 = arith.constant 0 : i32
    %c0_i32_1 = arith.constant 0 : i32
    return %c0_i32, %c0_i32_0 : i32, i32
  }
  func.func @transform_7(%arg0: i32) -> (i32, i32) {
    %c0_i32 = arith.constant 0 : i32
    %c0_i32_0 = arith.constant 0 : i32
    %c0_i32_1 = arith.constant 0 : i32
    return %c0_i32, %c0_i32_0 : i32, i32
  }
  func.func @transform_8(%arg0: i32) -> (i32, i32) {
    %c0_i32 = arith.constant 0 : i32
    %c0_i32_0 = arith.constant 0 : i32
    return %arg0, %c0_i32 : i32, i32
  }
}

</mosaic_0001>

<bundles_post_ra>
// kernel: _mynet_forward_impl.1
= control target key start
LH: loop header
LB: loop body
LE: loop exit
PB: predicated region body
PF: predicated region fallthrough
CT: control target
= control target key end

     0   :  { %13 = vsyncpa [#allocation3], 0  ;;  %s1053_s0 = inlined_call_operand.vmem [shape: bf16[8,32], index: 0, kind: input, shape index: {}]   ;;  %s1054_s1 = inlined_call_operand.hbm [shape: bf16[32,512], index: 1, kind: input, shape index: {}]   ;;  %s1055_s2 = inlined_call_operand.vmem [shape: f32[1,512], index: 2, kind: input, shape index: {}]   ;;  %s1056_s3 = inlined_call_operand.hbm [shape: bf16[512,128], index: 3, kind: input, shape index: {}]   ;;  %s1057_s4 = inlined_call_operand.vmem [shape: f32[1,128], index: 4, kind: input, shape index: {}]   ;;  %s1058_s5 = inlined_call_operand.hbm [shape: bf16[128,128], index: 5, kind: input, shape index: {}]   ;;  %s1059_s6 = inlined_call_operand.vmem [shape: f32[1,128], index: 6, kind: input, shape index: {}]   ;;  %s1060_s7 = inlined_call_operand.vmem [shape: f32[1,128], index: 7, kind: input, shape index: {}]   ;;  %s1061_s8 = inlined_call_operand.vmem [shape: f32[8,128], index: 8, kind: output, shape index: {}]  }
   0x1   :  { %14 = vsyncpa [#allocation5], 0  ;;  %s36_s29 = sshll.u32 %s1056_s3, 4  ;;  %s970_s30 = smov [#allocation4]   ;;  %s37_s29 = int_to_ptr.hbm [resolvable:$true] %s36_s29 }
   0x2   :  { %s38_s9 = sshll.u32 %s970_s30, 4  ;;  %s21_s12 = sshll.u32 %s1054_s1, 4  ;;  %s39_s9 = int_to_ptr.vmem [resolvable:$true] %s38_s9  ;;  %s22_s12 = int_to_ptr.hbm [resolvable:$true] %s21_s12 }
   0x3   :  { %s971_s13 = smov 64   ;;  %s972_s14 = smov 4  }
   0x4   :  { %44 = dma.hbm_to_vmem [thread:$0]  %s37_s29, 4096, %s39_s9, [#allocation5], %s971_s13, %s971_s13, %s972_s14  }
   0x5   :  { %s973_s15 = smov [#allocation2]   ;;  %s974_s17 = smov 256  }
   0x6   :  { %s23_s16 = sshll.u32 %s973_s15, 4  ;;  %s975_s18 = smov 16   ;;  %s24_s16 = int_to_ptr.vmem [resolvable:$true] %s23_s16 }
   0x7   :  { %29 = dma.hbm_to_vmem [thread:$0]  %s22_s12, 1024, %s24_s16, [#allocation3], %s974_s17, %s974_s17, %s975_s18  }
   0x8   :  { %s51_s20 = sshll.u32 %s1058_s5, 4  ;;  %s976_s21 = smov [#allocation6]   ;;  %s52_s20 = int_to_ptr.hbm [resolvable:$true] %s51_s20 }
   0x9   :  { %s53_s22 = sshll.u32 %s976_s21, 4  ;;  %s54_s22 = int_to_ptr.vmem [resolvable:$true] %s53_s22 }
   0xa   :  { %59 = dma.hbm_to_vmem [thread:$0]  %s52_s20, 1024, %s54_s22, [#allocation5], %s971_s13, %s971_s13, %s972_s14  }
   0xb   :  { %966 = dma.done.wait [#allocation3], 1024  }
   0xc   :  { %967 = vsyncadd [#allocation3], 4294966272 }
   0xd   :  { %968 = dma.done.wait [#allocation5], 5120  }
   0xe   :  { %969 = vsyncadd [#allocation5], 4294962176  ;;  %v654_v0 = vld [vmem:[#allocation2 + $0x20] sm:$0xf]  ;;  %v838_v1 = vld [vmem:[#allocation2 + $0x2c] sm:$0xf0] }
   0xf   :  { %v662_v2 = vld [vmem:[#allocation2 + $0x28] sm:$0xf]  ;;  %v655_v3 = vor.u32 %v838_v1, %v654_v0  ;;  %v839_v4 = vld [vmem:[#allocation2 + $0x34] sm:$0xf0]  ;;  %v837_v5 = vld [vmem:[#allocation2 + $0x2c] sm:$0xf] }
  0x10   :  { %v664_v6 = vld [vmem:[#allocation2 + $0x38] sm:$0xf0]  ;;  %v663_v7 = vor.u32 %v839_v4, %v662_v2  ;;  %v638_v9 = vld [vmem:[#allocation2] sm:$0xf]  ;;  %v834_v10 = vld [vmem:[#allocation2 + $0xc] sm:$0xf0] }
  0x11   :  { %v667_v8 = vor.u32 %v837_v5, %v664_v6  ;;  %v646_v11 = vld [vmem:[#allocation2 + $0x8] sm:$0xf]  ;;  %146 = vmatpush.bf16.msra.mxu1 %v655_v3  ;;  %v639_v12 = vor.u32 %v834_v10, %v638_v9  ;;  %v835_v13 = vld [vmem:[#allocation2 + $0x14] sm:$0xf0]  ;;  %v833_v14 = vld [vmem:[#allocation2 + $0xc] sm:$0xf] }
  0x12   :  { %v648_v15 = vld [vmem:[#allocation2 + $0x18] sm:$0xf0]  ;;  %172 = vmatpush.bf16.msra.mxu2 %v663_v7  ;;  %v647_v16 = vor.u32 %v835_v13, %v646_v11  ;;  %v836_v18 = vld [vmem:[#allocation2 + $0x24] sm:$0xf]  ;;  %v656_v19 = vld [vmem:[#allocation2 + $0x30] sm:$0xf0] }
  0x13   :  { %185 = vmatpush.bf16.msra.mxu3 %v667_v8  ;;  %v651_v17 = vor.u32 %v833_v14, %v648_v15  ;;  %v659_v20 = vor.u32 %v836_v18, %v656_v19  ;;  %v832_v21 = vld [vmem:[#allocation2 + $0x4] sm:$0xf]  ;;  %v847_v22 = vld [vmem:[#allocation4 + $0x38] sm:$0xff]  ;;  %v640_v23 = vld [vmem:[#allocation2 + $0x10] sm:$0xf0]  ;;  %vm136_vm0 = vcmask 261120  }
  0x14   :  { %v863_v24 = vld [vmem:[#allocation4 + $0xb8] sm:$0xff]  ;;  %v77_v26 = vld [vmem:[%s1053_s0] sm:$0xf]  ;;  %460 = vmatpush.bf16.msra.mxu0 %v847_v22  ;;  %v846_v27 = vld [vmem:[#allocation4 + $0x30] sm:$0xff]  ;;  %v643_v28 = vor.u32 %v832_v21, %v640_v23 }
  0x15   :  { %v871_v25 = vld [vmem:[#allocation4 + $0xf8] sm:$0xff]  ;;  %147 = vmatpush.bf16.msra.mxu1 %v639_v12  ;;  %v862_v29 = vld [vmem:[#allocation4 + $0xb0] sm:$0xff]  ;;  %v845_v32 = vld [vmem:[#allocation4 + $0x28] sm:$0xff] }
  0x16   :  { %173 = vmatpush.bf16.msra.mxu2 %v647_v16  ;;  %v870_v30 = vld [vmem:[#allocation4 + $0xf0] sm:$0xff]  ;;  %v855_v31 = vld [vmem:[#allocation4 + $0x78] sm:$0xff]  ;;  %v861_v33 = vld [vmem:[#allocation4 + $0xa8] sm:$0xff] }
  0x17   :  { %186 = vmatpush.bf16.msra.mxu3 %v651_v17  ;;  %v869_v34 = vld [vmem:[#allocation4 + $0xe8] sm:$0xff]  ;;  %v854_v35 = vld [vmem:[#allocation4 + $0x70] sm:$0xff]  ;;  %v844_v36 = vld [vmem:[#allocation4 + $0x20] sm:$0xff] }
  0x18   :  { %668 = vmatmul.msk.bf16.vlgmr.msra.gmra.mxu1 %vm136_vm0, %v77_v26  ;;  %461 = vmatpush.bf16.msra.mxu0 %v846_v27  ;;  %v860_v37 = vld [vmem:[#allocation4 + $0xa0] sm:$0xff]  ;;  %v843_v39 = vld [vmem:[#allocation4 + $0x18] sm:$0xff]  ;;  %v842_v42 = vld [vmem:[#allocation4 + $0x10] sm:$0xff] }
  0x19   :  { %159 = vmatpush.bf16.msrb.mxu1 %v659_v20  ;;  %670 = vmatmul.msk.bf16.vlgmr.msra.gmra.mxu2 %vm136_vm0, %v77_v26  ;;  %v868_v38 = vld [vmem:[#allocation4 + $0xe0] sm:$0xff]  ;;  %v859_v40 = vld [vmem:[#allocation4 + $0x98] sm:$0xff]  ;;  %v841_v43 = vld [vmem:[#allocation4 + $0x8] sm:$0xff] }
  0x1a   :  { %486 = vmatpush.bf16.msrb.mxu2 %v863_v24  ;;  %671 = vmatmul.msk.bf16.vlgmr.msra.gmra.mxu3 %vm136_vm0, %v77_v26  ;;  %v867_v41 = vld [vmem:[#allocation4 + $0xd8] sm:$0xff]  ;;  %v853_v44 = vld [vmem:[#allocation4 + $0x68] sm:$0xff]  ;;  %v858_v45 = vld [vmem:[#allocation4 + $0x90] sm:$0xff] }
  0x1b   :  { %499 = vmatpush.bf16.msrb.mxu3 %v871_v25  ;;  %v866_v46 = vld [vmem:[#allocation4 + $0xd0] sm:$0xff]  ;;  %v840_v47 = vld [vmem:[#allocation4] sm:$0xff]  ;;  %v857_v49 = vld [vmem:[#allocation4 + $0x88] sm:$0xff] }
  0x1c   :  { %462 = vmatpush.bf16.msra.mxu0 %v845_v32  ;;  %v852_v48 = vld [vmem:[#allocation4 + $0x60] sm:$0xff]  ;;  %v865_v50 = vld [vmem:[#allocation4 + $0xc8] sm:$0xff]  ;;  %v851_v51 = vld [vmem:[#allocation4 + $0x58] sm:$0xff] }
  0x1d   :  { %160 = vmatpush.bf16.msrb.mxu1 %v643_v28  ;;  %v856_v52 = vld [vmem:[#allocation4 + $0x80] sm:$0xff]  ;;  %v850_v54 = vld [vmem:[#allocation4 + $0x50] sm:$0xff]  ;;  %v849_v55 = vld [vmem:[#allocation4 + $0x48] sm:$0xff] }
  0x1e   :  { %487 = vmatpush.bf16.msrb.mxu2 %v862_v29  ;;  %v864_v53 = vld [vmem:[#allocation4 + $0xc0] sm:$0xff]  ;;  %v879_v57 = vld [vmem:[#allocation6 + $0x38] sm:$0xff]  ;;  %v878_v19 = vld [vmem:[#allocation6 + $0x30] sm:$0xff] }
  0x1f   :  { %500 = vmatpush.bf16.msrb.mxu3 %v870_v30  ;;  %v848_v56 = vld [vmem:[#allocation4 + $0x40] sm:$0xff]  ;;  %v877_v20 = vld [vmem:[#allocation6 + $0x28] sm:$0xff]  ;;  %v875_v22 = vld [vmem:[#allocation6 + $0x18] sm:$0xff] }
  0x20   :  { %463 = vmatpush.bf16.msra.mxu0 %v844_v36  ;;  %v86_v58 = vld [vmem:[%s1055_s2] sm:$0xf]  ;;  %v874_v23 = vld [vmem:[#allocation6 + $0x10] sm:$0xff]  ;;  %v873_v24 = vld [vmem:[#allocation6 + $0x8] sm:$0xff] }
  0x21   :  { %473 = vmatpush.bf16.msra.mxu1 %v855_v31  ;;  %v88_v59 = vperm.slane %v86_v58, 0  ;;  %v90_v63 = vperm.slane %v86_v58, 2  ;;  %v91_v0 = vperm.slane %v86_v58, 3  ;;  %v89_v11 = vperm.slane %v86_v58, 1  ;;  %v876_v21 = vld [vmem:[#allocation6 + $0x20] sm:$0xff] }
  0x22   :  { %488 = vmatpush.bf16.msrb.mxu2 %v861_v33  ;;  %v872_v25 = vld [vmem:[#allocation6] sm:$0xff] }
  0x23   :  { %501 = vmatpush.bf16.msrb.mxu3 %v869_v34  ;;  %v887_v28 = vld [vmem:[%s1057_s4] ss:$0 sm:$0xff] }
  0x24   :  { %464 = vmatpush.bf16.msra.mxu0 %v843_v39 }
  0x25   :  { %474 = vmatpush.bf16.msra.mxu1 %v854_v35 }
  0x26   :  { %489 = vmatpush.bf16.msrb.mxu2 %v860_v37 }
  0x27   :  { %502 = vmatpush.bf16.msrb.mxu3 %v868_v38 }
  0x28   :  { %669 = vmatmul.msk.bf16.vlgmr.msrb.gmra.mxu1 %vm136_vm0, %v77_v26  ;;  %465 = vmatpush.bf16.msra.mxu0 %v842_v42  ;;  %v889_v42 = vld [vmem:[%s1060_s7] ss:$0 sm:$0xff] }
  0x29   :  { %475 = vmatpush.bf16.msra.mxu1 %v853_v44 }
  0x2a   :  { %490 = vmatpush.bf16.msrb.mxu2 %v859_v40 }
  0x2b   :  { %503 = vmatpush.bf16.msrb.mxu3 %v867_v41 }
  0x2c   :  { %466 = vmatpush.bf16.msra.mxu0 %v841_v43 }
  0x2d   :  { %476 = vmatpush.bf16.msra.mxu1 %v852_v48 }
  0x2e   :  { %491 = vmatpush.bf16.msrb.mxu2 %v858_v45 }
  0x2f   :  { %504 = vmatpush.bf16.msrb.mxu3 %v866_v46 }
  0x30   :  { %467 = vmatpush.bf16.msra.mxu0 %v840_v47 }
  0x31   :  { %477 = vmatpush.bf16.msra.mxu1 %v851_v51 }
  0x32   :  { %492 = vmatpush.bf16.msrb.mxu2 %v857_v49 }
  0x33   :  { %505 = vmatpush.bf16.msrb.mxu3 %v865_v50 }
  0x34   :  { %580 = vmatpush.bf16.msrb.mxu0 %v879_v57 }
  0x35   :  { %478 = vmatpush.bf16.msra.mxu1 %v850_v54 }
  0x36   :  { %493 = vmatpush.bf16.msrb.mxu2 %v856_v52 }
  0x37   :  { %506 = vmatpush.bf16.msrb.mxu3 %v864_v53  ;;  %v625_v53 = vlaneseq }
  0x38   :  { %581 = vmatpush.bf16.msrb.mxu0 %v878_v19 }
  0x39   :  { %479 = vmatpush.bf16.msra.mxu1 %v849_v55  ;;  %v626_v58 = vand.u32 127, %v625_v53 }
  0x3b   :  { %vm627_vm6 = vcmp.lt.s32.totalorder %v626_v58, 64 }
  0x3c   :  { %582 = vmatpush.bf16.msrb.mxu0 %v877_v20 }
  0x3d   :  { %480 = vmatpush.bf16.msra.mxu1 %v848_v56 }
  0x40   :  { %583 = vmatpush.bf16.msrb.mxu0 %v876_v21 }
  0x44   :  { %584 = vmatpush.bf16.msrb.mxu0 %v875_v22 }
  0x48   :  { %585 = vmatpush.bf16.msrb.mxu0 %v874_v23 }
  0x4c   :  { %586 = vmatpush.bf16.msrb.mxu0 %v873_v24 }
  0x50   :  { %587 = vmatpush.bf16.msrb.mxu0 %v872_v25 }
  0x95   :  { %v149_v60 = vpop.f32.mrf.mxu1 }
  0x96   :  { %v150_v61 = vadd.f32 %v149_v60, %v88_v59  ;;  %v888_v59 = vld [vmem:[%s1059_s6] ss:$0 sm:$0xff] }
  0x98   :  { %v192_v62 = vmax.f32 %v150_v61, 0.0 }
  0x9a   :  { %v196_v1 = vpack.c.bf16 %v192_v62, %v192_v62 }
  0x9c   :  { %v175_v2 = vpop.f32.mrf.mxu2  ;;  %468 = vmatmul.bf16.vlgmr.msra.gmra.mxu0 %v196_v1 }
  0x9d   :  { %v188_v3 = vpop.f32.mrf.mxu3  ;;  %v176_v4 = vadd.f32 %v175_v2, %v90_v63  ;;  %v151_v6 = vpop.f32.mrf.mxu1 }
  0x9e   :  { %v189_v5 = vadd.f32 %v188_v3, %v91_v0 }
  0x9f   :  { %v194_v7 = vmax.f32 %v176_v4, 0.0 }
  0xa0   :  { %v195_v8 = vmax.f32 %v189_v5, 0.0 }
  0xa1   :  { %v198_v9 = vpack.c.bf16 %v194_v7, %v194_v7 }
  0xa2   :  { %v199_v10 = vpack.c.bf16 %v195_v8, %v195_v8 }
  0xa3   :  { %494 = vmatmul.bf16.vlgmr.msrb.gmra.mxu2 %v198_v9 }
  0xa4   :  { %507 = vmatmul.bf16.vlgmr.msrb.gmra.mxu3 %v199_v10  ;;  %v177_v12 = vpop.f32.mrf.mxu2 }
  0xa5   :  { %v190_v13 = vpop.f32.mrf.mxu3  ;;  %v162_v14 = vpop.f32.mrf.mxu1 }
  0xa6   :  { %v163_v15 = vadd.f32 %v162_v14, %v89_v11 }
  0xa8   :  { %v193_v16 = vmax.f32 %v163_v15, 0.0 }
  0xaa   :  { %v197_v17 = vpack.c.bf16 %v193_v16, %v193_v16 }
  0xac   :  { %481 = vmatmul.bf16.vlgmr.msra.gmra.mxu1 %v197_v17 }
  0xad   :  { %v164_v18 = vpop.f32.mrf.mxu1 }
 0x119   :  { %v469_v26 = vpop.f32.mrf.mxu0 }
 0x11a   :  { %v470_v31 = vadd.f32 %v887_v28, %v469_v26 }
 0x121   :  { %v471_v27 = vpop.f32.mrf.mxu0 }
 0x126   :  { %v495_v29 = vpop.f32.mrf.mxu2 }
 0x127   :  { %v508_v30 = vpop.f32.mrf.mxu3 }
 0x129   :  { %v482_v32 = vpop.f32.mrf.mxu1 }
 0x12a   :  { %v483_v33 = vadd.f32 %v482_v32, %v470_v31 }
 0x12c   :  { %v496_v34 = vadd.f32 %v495_v29, %v483_v33 }
 0x12e   :  { %v509_v35 = vadd.f32 %v508_v30, %v496_v34  ;;  %v497_v36 = vpop.f32.mrf.mxu2 }
 0x12f   :  { %v510_v37 = vpop.f32.mrf.mxu3 }
 0x130   :  { %vm512_vm1 = vcmp.ge.f32.partialorder %v509_v35, 0.0  ;;  %v513_v38 = vmul.f32 0.01, %v509_v35 }
 0x131   :  { %v484_v39 = vpop.f32.mrf.mxu1 }
 0x132   :  { %v514_v40 = vsel %vm512_vm1, %v509_v35, %v513_v38 }
 0x133   :  { %v515_v41 = vpack.c.bf16 %v514_v40, %v514_v40 }
 0x135   :  { %588 = vmatmul.bf16.vlgmr.msrb.gmra.mxu0 %v515_v41 }
 0x1b2   :  { %v589_v43 = vpop.f32.mrf.mxu0 }
 0x1b3   :  { %v602_v44 = vadd.f32 %v889_v42, %v589_v43  ;;  %v597_v0 = vadd.f32 %v888_v59, %v589_v43 }
 0x1b5   :  { %603 = vmax.xlane.f32.xlu0 %v602_v44 }
 0x1ba   :  { %v591_v45 = vpop.f32.mrf.mxu0 }
 0x228   :  { %v604_v46 = vpop.xlane.xlu0 %603 }
 0x229   :  { %v605_v47 = vsub.f32 %v602_v44, %v604_v46 }
 0x22b   :  { %v606_v48 = vmul.f32 1.442695, %v605_v47 }
 0x22d   :  { %890 = vpow2.f32 %v606_v48 }
 0x233   :  { %v891_v49 = vpop.eup %890 }
 0x234   :  { %608 = vadd.xlane.f32.xlu0 %v891_v49 }
 0x2a7   :  { %v609_v50 = vpop.xlane.xlu0 %608 }
 0x2a8   :  { %892 = vrcp.f32 %v609_v50  ;;  %v621_v55 = vand.u32 2147483648, %v609_v50  ;;  %v619_v57 = vand.u32 2147483647, %v609_v50  ;;  %vm615_vm3 = vweird.f32 %v609_v50 }
 0x2aa   :  { %v622_v61 = vor.u32 1.1754944e-38, %v621_v55  ;;  %vm620_vm5 = vcmp.eq.f32.partialorder %v619_v57, 8.507059e+37 }
 0x2ae   :  { %v893_v51 = vpop.eup %892 }
 0x2af   :  { %v611_v52 = vmul.f32 %v893_v51, %v609_v50  ;;  %vm616_vm2 = vweird.f32 %v893_v51 }
 0x2b0   :  { %vm617_vm4 = vmor %vm615_vm3, %vm616_vm2 }
 0x2b1   :  { %v612_v54 = vsub.f32 1.0, %v611_v52 }
 0x2b3   :  { %v613_v56 = vmul.f32 %v893_v51, %v612_v54 }
 0x2b5   :  { %v614_v60 = vadd.f32 %v893_v51, %v613_v56 }
 0x2b7   :  { %v618_v62 = vsel %vm617_vm4, %v893_v51, %v614_v60 }
 0x2b8   :  { %v623_v63 = vsel %vm620_vm5, %v622_v61, %v618_v62 }
 0x2b9   :  { %v624_v1 = vmul.f32 %v891_v49, %v623_v63 }
 0x2bb   :  { %v628_v2 = vsel %vm627_vm6, %v597_v0, %v624_v1 }
 0x2bc   :  { %629 = vst [vmem:[%s1061_s8] sm:$0xff] %v628_v2 }
 0x2bd   :  { %634 = vsyncpa [#allocation3], 1 }
 0x2be   :  { %635 = vsyncpa [#allocation5], 1 }

</bundles_post_ra>
